<compile_context>
chip_gen: v6e
topology: v6e:2x2x1
jax: 0.10.0
libtpu: 0.0.40
codegen_flags: <defaults>
</compile_context>

<pallas_src>
import jax
import jax.numpy as jnp
from jax.experimental import pallas as pl
from jax.experimental.pallas import tpu as pltpu


def _round_up(x, m):
    return ((x + m - 1) // m) * m


def _sublane_multiple(dtype):
    # Sub-32-bit dtypes pack along sublanes; align the second-to-last tile dim.
    return {4: 8, 2: 16, 1: 32}.get(jnp.dtype(dtype).itemsize, 8)


# --------------------------- kernels ---------------------------------------

def _mm_kernel(x_ref, w_ref, o_ref, acc_ref):
    """Multi-K-step: f32 accumulator, init at k==0, flush at last k."""
    @pl.when(pl.program_id(2) == 0)
    def _():
        acc_ref[...] = jnp.zeros_like(acc_ref)

    acc_ref[...] += jnp.dot(x_ref[...], w_ref[...],
                            preferred_element_type=jnp.float32)

    @pl.when(pl.program_id(2) == pl.num_programs(2) - 1)
    def _():
        o_ref[...] = acc_ref[...].astype(o_ref.dtype)


def _mm_bias_kernel(x_ref, w_ref, b_ref, o_ref, acc_ref):
    @pl.when(pl.program_id(2) == 0)
    def _():
        acc_ref[...] = jnp.zeros_like(acc_ref)

    acc_ref[...] += jnp.dot(x_ref[...], w_ref[...],
                            preferred_element_type=jnp.float32)

    # Bias is added exactly once, on the final K step.
    @pl.when(pl.program_id(2) == pl.num_programs(2) - 1)
    def _():
        o_ref[...] = (acc_ref[...] + b_ref[...].astype(jnp.float32)
                      ).astype(o_ref.dtype)


def _mm_kernel_1k(x_ref, w_ref, o_ref):
    """Single-K-step: no scratch, no control flow."""
    o_ref[...] = jnp.dot(x_ref[...], w_ref[...],
                         preferred_element_type=jnp.float32).astype(o_ref.dtype)


def _mm_bias_kernel_1k(x_ref, w_ref, b_ref, o_ref):
    acc = jnp.dot(x_ref[...], w_ref[...], preferred_element_type=jnp.float32)
    o_ref[...] = (acc + b_ref[...].astype(jnp.float32)).astype(o_ref.dtype)


# --------------------------- wrapper ----------------------------------------

def _pick_tk(K):
    # The K tile must divide K exactly (a ragged K block would feed pad
    # garbage into the accumulator) and be lane-aligned (multiple of 128) or
    # equal to K.
    if K % 128 != 0:
        return K
    for cand in (2048, 1024, 512, 256, 128):
        if K % cand == 0:
            return cand
    return K


def pallas_linear(x2d, weight_kn, bias_vec=None, *, tm=None, tn=None, tk=None):
    """y = x2d @ weight_kn (+ bias).  x2d: (M, K); weight_kn: (K, N); bias: (N,)."""
    M, K = x2d.shape
    Kw, N = weight_kn.shape
    assert K == Kw, (K, Kw)

    sub = _sublane_multiple(x2d.dtype)
    if tm is None:
        tm = min(256, _round_up(M, sub))               # ragged last M block is masked
    if tn is None:
        tn = N if N <= 128 else min(512, _round_up(N, 128))   # lane-dense writeback
    if tk is None:
        tk = _pick_tk(K)
    assert K % tk == 0, (K, tk)

    k_steps = K // tk
    has_bias = bias_vec is not None
    bias2d = bias_vec.reshape(1, N) if has_bias else None

    bytes_accessed = int(
        x2d.size * x2d.dtype.itemsize
        + weight_kn.size * weight_kn.dtype.itemsize
        + M * N * x2d.dtype.itemsize
        + (N * x2d.dtype.itemsize if has_bias else 0))
    cost = pl.CostEstimate(flops=2 * M * N * K, transcendentals=0,
                           bytes_accessed=bytes_accessed)

    if k_steps == 1:
        # -------- single K step: 2-D grid, no accumulator scratch ----------
        grid = (pl.cdiv(M, tm), pl.cdiv(N, tn))
        in_specs = [
            pl.BlockSpec((tm, K), lambda i, j: (i, 0)),
            pl.BlockSpec((K, tn), lambda i, j: (0, j)),
        ]
        args = [x2d, weight_kn]
        if has_bias:
            in_specs.append(pl.BlockSpec((1, tn), lambda i, j: (0, j)))
            args.append(bias2d)
            kernel = _mm_bias_kernel_1k
        else:
            kernel = _mm_kernel_1k
        grid_spec = pltpu.PrefetchScalarGridSpec(
            num_scalar_prefetch=0, grid=grid, in_specs=in_specs,
            out_specs=pl.BlockSpec((tm, tn), lambda i, j: (i, j)),
            scratch_shapes=[])
        dims = ("parallel", "parallel")
    else:
        # -------- multiple K steps: 3-D grid + f32 accumulator -------------
        grid = (pl.cdiv(M, tm), pl.cdiv(N, tn), k_steps)
        in_specs = [
            pl.BlockSpec((tm, tk), lambda i, j, k: (i, k)),   # x row-tile
            pl.BlockSpec((tk, tn), lambda i, j, k: (k, j)),   # weight (K, N) tile
        ]
        args = [x2d, weight_kn]
        if has_bias:
            in_specs.append(pl.BlockSpec((1, tn), lambda i, j, k: (0, j)))
            args.append(bias2d)
            kernel = _mm_bias_kernel
        else:
            kernel = _mm_kernel
        grid_spec = pltpu.PrefetchScalarGridSpec(
            num_scalar_prefetch=0, grid=grid, in_specs=in_specs,
            out_specs=pl.BlockSpec((tm, tn), lambda i, j, k: (i, j)),
            scratch_shapes=[pltpu.VMEM((tm, tn), jnp.float32)])
        dims = ("parallel", "parallel", "arbitrary")

    out = pl.pallas_call(
        kernel,
        out_shape=jax.ShapeDtypeStruct((M, N), x2d.dtype),
        grid_spec=grid_spec,
        compiler_params=pltpu.CompilerParams(
            dimension_semantics=dims,
            vmem_limit_bytes=48 * 1024 * 1024,
        ),
        cost_estimate=cost,
    )(*args)
    return out


# --------------------------- module ------------------------------------------

class RowParallelLinear:
    """JAX/Pallas port of aphrodite RowParallelLinear with
    UnquantizedLinearMethod, single device (tp_size == 1)."""

    def __init__(self, input_size, output_size, bias=True,
                 input_is_parallel=True, skip_bias_add=False,
                 params_dtype=jnp.float32, reduce_results=True, key=None):
        self.input_size = input_size
        self.output_size = output_size
        self.input_is_parallel = input_is_parallel
        self.skip_bias_add = skip_bias_add
        self.reduce_results = reduce_results
        self.params_dtype = params_dtype
        self.tp_size = 1                      # single-device port
        self.input_size_per_partition = input_size // self.tp_size

        if not reduce_results and bias and not skip_bias_add:
            raise ValueError("When not reduce the results, adding bias to the "
                             "results can lead to incorrect results")

        if key is None:
            key = jax.random.PRNGKey(0)
        wkey, bkey = jax.random.split(key)
        # weight: (output_size, input_size_per_partition) — torch convention.
        self.weight = (jax.random.normal(
            wkey, (output_size, self.input_size_per_partition),
            dtype=jnp.float32) * 0.02).astype(params_dtype)
        # One-time (K, N) layout so every kernel step is a standard contraction.
        self.weight_t = jnp.asarray(self.weight.T)
        if bias:
            self.bias = (jax.random.normal(bkey, (output_size,),
                                           dtype=jnp.float32) * 0.02
                         ).astype(params_dtype)
        else:
            self.bias = None

    def __call__(self, x):
        # TODO(synk): tp_size > 1 path (split_tensor_along_last_dim +
        # tensor_model_parallel_all_reduce) not implemented — single device,
        # so both input_is_parallel branches and reduce_results are identity.
        lead_shape = x.shape[:-1]
        x2d = x.reshape(-1, self.input_size_per_partition)

        add_bias_in_kernel = (self.bias is not None) and (not self.skip_bias_add)
        out2d = pallas_linear(x2d, self.weight_t,
                              self.bias if add_bias_in_kernel else None)
        output = out2d.reshape(*lead_shape, self.output_size)

        output_bias = self.bias if self.skip_bias_add else None
        return output, output_bias


# --------------------------- self-test ----------------------------------------

if __name__ == "__main__":
    key = jax.random.PRNGKey(0)
    kx, kp, kx2, kp2 = jax.random.split(key, 4)

    batch, seq, input_size, output_size = 2, 8, 32, 64
    x = jax.random.normal(kx, (batch, seq, input_size), dtype=jnp.float32)

    def ref_linear(x, w, b=None):
        y = jnp.einsum("...k,nk->...n", x, w,
                       precision=jax.lax.Precision.HIGHEST)
        return y if b is None else y + b

    # 1) fused-bias path (single K-step kernel)
    layer = RowParallelLinear(input_size, output_size, bias=True,
                              skip_bias_add=False, key=kp)
    out, out_bias = layer(x)
    out = jax.block_until_ready(out)
    ref = ref_linear(x, layer.weight, layer.bias)
    assert out.shape == (batch, seq, output_size)
    assert out_bias is None
    assert jnp.allclose(out, ref, atol=1e-3, rtol=1e-3), "mismatch (bias)"

    # 2) skip_bias_add path (bias returned, not added in kernel)
    layer2 = RowParallelLinear(input_size, output_size, bias=True,
                               skip_bias_add=True, key=kp)
    out2, out_bias2 = layer2(x)
    out2 = jax.block_until_ready(out2)
    ref2 = ref_linear(x, layer2.weight)
    assert jnp.allclose(out2, ref2, atol=1e-3, rtol=1e-3), "mismatch (skip bias)"
    assert out_bias2 is not None and out_bias2.shape == (output_size,)

    # 3) no-bias path
    layer3 = RowParallelLinear(input_size, output_size, bias=False, key=kp)
    out3, out_bias3 = layer3(x)
    out3 = jax.block_until_ready(out3)
    ref3 = ref_linear(x, layer3.weight)
    assert jnp.allclose(out3, ref3, atol=1e-3, rtol=1e-3), "mismatch (no bias)"
    assert out_bias3 is None

    # 4) multi-K-step accumulator path (K = 384 -> tk = 128, 3 K steps)
    in4, out4_sz = 384, 256
    x4 = jax.random.normal(kx2, (batch, seq, in4), dtype=jnp.float32)
    layer4 = RowParallelLinear(in4, out4_sz, bias=True,
                               skip_bias_add=False, key=kp2)
    out4, _ = layer4(x4)
    out4 = jax.block_until_ready(out4)
    ref4 = ref_linear(x4, layer4.weight, layer4.bias)
    assert out4.shape == (batch, seq, out4_sz)
    assert jnp.allclose(out4, ref4, atol=2e-3, rtol=2e-3), "mismatch (multi-K)"

    print("KERNEL_OK")
</pallas_src>

<mosaic_0001>
module attributes {stable_mosaic.version = 11 : i64} {
  func.func @_mm_bias_kernel_1k(%arg0: i32, %arg1: i32, %arg2: memref<16x32xf32, #tpu.memory_space<vmem>>, %arg3: memref<32x64xf32, #tpu.memory_space<vmem>>, %arg4: memref<1x64xf32, #tpu.memory_space<vmem>>, %arg5: memref<16x64xf32, #tpu.memory_space<vmem>>) attributes {dimension_semantics = [#tpu.dimension_semantics<parallel>, #tpu.dimension_semantics<parallel>], iteration_bounds = array<i64: 1, 1>, scalar_prefetch = 0 : i64, scratch_operands = 0 : i64, tpu.core_type = #tpu.core_type<tc>, window_params = [{transform_indices = @transform_0, window_bounds = array<i64: 16, 32>}, {transform_indices = @transform_1, window_bounds = array<i64: 32, 64>}, {transform_indices = @transform_2, window_bounds = array<i64: 1, 64>}, {transform_indices = @transform_3, window_bounds = array<i64: 16, 64>}]} {
    %c0 = arith.constant 0 : index
    %c0_0 = arith.constant 0 : index
    %0 = vector.load %arg2[%c0, %c0_0] : memref<16x32xf32, #tpu.memory_space<vmem>>, vector<16x32xf32>
    %c0_1 = arith.constant 0 : index
    %c0_2 = arith.constant 0 : index
    %1 = vector.load %arg3[%c0_1, %c0_2] : memref<32x64xf32, #tpu.memory_space<vmem>>, vector<32x64xf32>
    %cst = arith.constant dense<0.000000e+00> : vector<16x64xf32>
    %2 = tpu.matmul %0, %1, %cst {dimension_numbers = #tpu.dot_dimension_numbers<[1], [0], [0], [1], [0, 0, 1, 1], [], []>} : vector<16x32xf32>, vector<32x64xf32>, vector<16x64xf32> -> vector<16x64xf32>
    %c0_3 = arith.constant 0 : index
    %c0_4 = arith.constant 0 : index
    %3 = vector.load %arg4[%c0_3, %c0_4] : memref<1x64xf32, #tpu.memory_space<vmem>>, vector<1x64xf32>
    %4 = vector.broadcast %3 : vector<1x64xf32> to vector<16x64xf32>
    %5 = arith.addf %2, %4 : vector<16x64xf32>
    %c0_5 = arith.constant 0 : index
    %c0_6 = arith.constant 0 : index
    %6 = vector.load %arg5[%c0_5, %c0_6] : memref<16x64xf32, #tpu.memory_space<vmem>>, vector<16x64xf32>
    tpu.vector_store %arg5[%c0_5, %c0_6], %5 {strides = array<i32>} : memref<16x64xf32, #tpu.memory_space<vmem>>, vector<16x64xf32>,
    return
  }
  func.func @transform_0(%arg0: i32, %arg1: i32) -> (i32, i32) {
    %c0_i32 = arith.constant 0 : i32
    %c0_i32_0 = arith.constant 0 : i32
    return %arg0, %c0_i32 : i32, i32
  }
  func.func @transform_1(%arg0: i32, %arg1: i32) -> (i32, i32) {
    %c0_i32 = arith.constant 0 : i32
    %c0_i32_0 = arith.constant 0 : i32
    return %c0_i32, %arg1 : i32, i32
  }
  func.func @transform_2(%arg0: i32, %arg1: i32) -> (i32, i32) {
    %c0_i32 = arith.constant 0 : i32
    %c0_i32_0 = arith.constant 0 : i32
    return %c0_i32, %arg1 : i32, i32
  }
  func.func @transform_3(%arg0: i32, %arg1: i32) -> (i32, i32) {
    %c0_i32 = arith.constant 0 : i32
    return %arg0, %arg1 : i32, i32
  }
}

</mosaic_0001>

<bundles_post_ra>
// kernel: tpu_custom_call.1
= control target key start
LH: loop header
LB: loop body
LE: loop exit
PB: predicated region body
PF: predicated region fallthrough
CT: control target
= control target key end

     0   :  { %8 = vsyncpa [#allocation3], 0  ;;  %s298_s0 = inlined_call_operand.hbm [shape: f32[16,32], index: 0, kind: input, shape index: {}]   ;;  %s299_s1 = inlined_call_operand.hbm [shape: f32[32,64], index: 1, kind: input, shape index: {}]   ;;  %s300_s2 = inlined_call_operand.vmem [shape: f32[1,64], index: 2, kind: input, shape index: {}]   ;;  %s301_s3 = inlined_call_operand.hbm [shape: f32[16,64], index: 3, kind: output, shape index: {}]  }
   0x1   :  { %9 = vsyncpa [#allocation6], 0 }
   0x2   :  { %10 = vsyncpa [#allocation4], 0  ;;  %s250_s12 = smov [#allocation2]  }
   0x3   :  { %s16_s13 = sshll.u32 %s250_s12, 4  ;;  %s17_s13 = int_to_ptr.vmem [resolvable:$true] %s16_s13 }
   0x4   :  { %s192_s14 = scalar_lea.vmem %s17_s13, 256  ;;  %p197_p1 = scmp.lt.s32.totalorder %s17_s13, %s17_s13 }
   0x5   :  { %p193_p0 = scmp.ne.s32.totalorder %s17_s13, %s192_s14  ;;  %p198_p2 = scmp.lt.s32.totalorder %s192_s14, %s192_s14 }
   0x7   :  { %p199_p3 = por %p198_p2, %p197_p1 }
   0x9   :  { %p200_p4 = pnand %p199_p3, %p193_p0 }
   0xb   :  { %203 = shalt.err (!%p200_p4)
}
   0xc   :  { %s251_s15 = smov 128   ;;  %s252_s16 = smov 8  }
   0xd   :  { %22 = dma.hbm_to_vmem [thread:$0]  %s298_s0, 256, %s17_s13, [#allocation3], %s251_s15, %s251_s15, %s252_s16  }
   0xe   :  { %s253_s19 = smov [#allocation5]  }
   0xf   :  { %s28_s20 = sshll.u32 %s253_s19, 4  ;;  %s29_s20 = int_to_ptr.vmem [resolvable:$true] %s28_s20 }
  0x10   :  { %s212_s21 = scalar_lea.vmem %s29_s20, 512  ;;  %p217_p6 = scmp.lt.s32.totalorder %s29_s20, %s29_s20 }
  0x11   :  { %p213_p5 = scmp.ne.s32.totalorder %s29_s20, %s212_s21  ;;  %p218_p7 = scmp.lt.s32.totalorder %s212_s21, %s212_s21 }
  0x13   :  { %p219_p8 = por %p218_p7, %p217_p6 }
  0x15   :  { %p220_p9 = pnand %p219_p8, %p213_p5 }
  0x17   :  { %223 = shalt.err (!%p220_p9)
}
  0x18   :  { %34 = dma.hbm_to_vmem [thread:$0]  %s299_s1, 512, %s29_s20, [#allocation6], %s251_s15, %s251_s15, %s252_s16  }
  0x19   :  { %244 = dma.done.wait [#allocation3], 256  }
  0x1a   :  { %245 = vsyncadd [#allocation3], 4294967040 }
  0x1b   :  { %246 = dma.done.wait [#allocation6], 512  }
  0x1c   :  { %247 = vsyncadd [#allocation6], 4294966784  ;;  %vm56_vm0 = vcmask 261120   ;;  %v48_v0 = vld [vmem:[#allocation5 + $0x18] sm:$0xff]  ;;  %v47_v1 = vld [vmem:[#allocation5 + $0x10] sm:$0xff]  ;;  %vm138_vm1 = vcmask 523264  }
  0x1d   :  { %168 = vmatprep.subr.mxu0 %v48_v0  ;;  %v43_v2 = vld [vmem:[#allocation2] sm:$0xff]  ;;  %v46_v3 = vld [vmem:[#allocation5 + $0x8] sm:$0xff]  ;;  %v45_v4 = vld [vmem:[#allocation5] sm:$0xff]  ;;  %s254_s24 = smov [#allocation7]  }
  0x1e   :  { %169 = vmatpush3.msra.mxu0 %v48_v0  ;;  %176 = vmatprep.mubr.msk.f32.mxu0 %vm56_vm0, %v43_v2  ;;  %v44_v5 = vld [vmem:[#allocation2 + $0x8] sm:$0xff]  ;;  %v159_v6 = vld [vmem:[%s300_s2] ss:$0 sm:$0xff]  ;;  %s146_s25 = sshll.u32 %s254_s24, 4  ;;  %s147_s25 = int_to_ptr.vmem [resolvable:$true] %s146_s25 }
  0x1f   :  { %170 = vmatprep.subr.mxu0 %v47_v1  ;;  %s224_s26 = scalar_lea.vmem %s147_s25, 256  ;;  %p229_p11 = scmp.lt.s32.totalorder %s147_s25, %s147_s25 }
  0x20   :  { %171 = vmatpush3.msra.mxu0 %v47_v1  ;;  %p225_p10 = scmp.ne.s32.totalorder %s147_s25, %s224_s26  ;;  %p230_p12 = scmp.lt.s32.totalorder %s224_s26, %s224_s26 }
  0x21   :  { %172 = vmatprep.subr.mxu0 %v46_v3 }
  0x22   :  { %173 = vmatpush3.msra.mxu0 %v46_v3  ;;  %p231_p13 = por %p230_p12, %p229_p11 }
  0x23   :  { %174 = vmatprep.subr.mxu0 %v45_v4 }
  0x24   :  { %175 = vmatpush3.msra.mxu0 %v45_v4  ;;  %p232_p0 = pnand %p231_p13, %p225_p10 }
  0x25   :  { %177 = vmatmul.mubr.msk.f32.vlgmr.msra.gmra.mxu0 %vm56_vm0, %v44_v5 }
  0xe5   :  { %v178_v7 = vpop.f32.mrf.mxu0 }
  0xe6   :  { %v135_v8 = vadd.f32 %v178_v7, %v159_v6 }
  0xe7   :  { %v129_v9 = vpop.f32.mrf.mxu0 }
  0xe8   :  { %v130_v10 = vadd.f32 %v159_v6, %v129_v9  ;;  %140 = vst.msk [vmem:[#allocation7 + $0x8] sm:$0xff] %vm138_vm1, %v135_v8 }
  0xea   :  { %139 = vst.msk [vmem:[#allocation7] sm:$0xff] %vm138_vm1, %v130_v10 }
  0xeb   :  { %235 = shalt.err (!%p232_p0)
}
  0xec   :  { %152 = dma.vmem_to_hbm [thread:$0]  %s147_s25, 256, %s301_s3, [#allocation4], %s251_s15, %s251_s15, %s252_s16  }
  0xed   :  { %248 = dma.done.wait [#allocation4], 256  }
  0xee   :  { %249 = vsyncadd [#allocation4], 4294967040 }
  0xef   :  { %156 = vsyncpa [#allocation3], 1 }
  0xf0   :  { %157 = vsyncpa [#allocation6], 1 }
  0xf1   :  { %158 = vsyncpa [#allocation4], 1 }

</bundles_post_ra>
